<compile_context>
chip_gen: v7x
topology: tpu7x:2x2x1
jax: 0.10.0
libtpu: 0.0.40
codegen_flags: <defaults>
</compile_context>

<pallas_src>
import jax
import jax.numpy as jnp
from jax.experimental import pallas as pl
from jax.experimental.pallas import tpu as pltpu

# Model hyper-parameters (module __init__ implies these three sizes).
VOCAB_SIZE = 64
MAX_LEN = 16
D_MODEL = 32
LN_EPS = 1e-5  # PyTorch nn.LayerNorm default


def _embedding_kernel(ids_ref, tok_hbm, pos_ref, gamma_ref, beta_ref,
                      out_ref, gather_buf, copy_sems):
    """One grid step == one batch element (S tokens).

    ids_ref    : [B, S] int32  SMEM (scalar-prefetched token ids)
    tok_hbm    : [V, D] f32    HBM raw ref (rows DMA-gathered on demand)
    pos_ref    : [S, D] f32    VMEM-resident positional rows 0..S-1
    gamma_ref  : [1, D] f32    LayerNorm weight
    beta_ref   : [1, D] f32    LayerNorm bias
    out_ref    : [1, S, D] f32 output tile for this batch element
    gather_buf : [S, D] f32    VMEM scratch for gathered token rows
    copy_sems  : [S]           DMA semaphores (one per gathered row)
    """
    b = pl.program_id(0)
    seq_len = gather_buf.shape[0]

    # --- token-row gather: S row DMAs HBM -> VMEM, issued back-to-back ---
    copies = []
    for s in range(seq_len):              # static Python loop (unrolled)
        tok_id = ids_ref[b, s]            # scalar read from SMEM
        cp = pltpu.make_async_copy(
            tok_hbm.at[pl.ds(tok_id, 1), :],
            gather_buf.at[pl.ds(s, 1), :],
            copy_sems.at[s])
        cp.start()
        copies.append(cp)
    for cp in copies:
        cp.wait()

    # --- positional embedding: plain broadcast VPU add (no matmul) ---
    emb = gather_buf[...] + pos_ref[...]                      # [S, D]

    # --- fused LayerNorm over the feature dim ---
    mean = jnp.mean(emb, axis=-1, keepdims=True)
    centered = emb - mean
    var = jnp.mean(centered * centered, axis=-1, keepdims=True)
    inv_std = jax.lax.rsqrt(var + LN_EPS)
    normed = centered * inv_std * gamma_ref[...] + beta_ref[...]
    out_ref[...] = normed[None].astype(out_ref.dtype)         # [1, S, D]


def embedding_forward(x, tok_table, pos_table, gamma, beta):
    """x: [B, S] integer token ids -> [B, S, D] float32."""
    B, S = x.shape
    V, D = tok_table.shape
    L = pos_table.shape[0]
    assert S <= L, f"seq_len {S} exceeds max_len {L}"

    ids = x.astype(jnp.int32)
    pos_used = pos_table[:S]              # [S, D] static slice, wrapper-side
    gamma2d = gamma.reshape(1, D)
    beta2d = beta.reshape(1, D)

    grid_spec = pltpu.PrefetchScalarGridSpec(
        num_scalar_prefetch=1,            # ids -> SMEM, passed to index_maps
        grid=(B,),
        in_specs=[
            pl.BlockSpec(memory_space=pl.ANY),             # token table in HBM
            pl.BlockSpec((S, D), lambda b, ids: (0, 0)),   # pos rows, resident
            pl.BlockSpec((1, D), lambda b, ids: (0, 0)),   # gamma
            pl.BlockSpec((1, D), lambda b, ids: (0, 0)),   # beta
        ],
        out_specs=pl.BlockSpec((1, S, D), lambda b, ids: (b, 0, 0)),
        scratch_shapes=[
            pltpu.VMEM((S, D), jnp.float32),
            pltpu.SemaphoreType.DMA((S,)),
        ],
    )

    n = B * S
    cost = pl.CostEstimate(
        flops=8 * n * D,                  # pos add + LayerNorm arithmetic
        transcendentals=n,                # one rsqrt per token
        bytes_accessed=4 * (n + 2 * n * D + S * D + 2 * D),
    )

    out = pl.pallas_call(
        _embedding_kernel,
        out_shape=jax.ShapeDtypeStruct((B, S, D), jnp.float32),
        grid_spec=grid_spec,
        compiler_params=pltpu.CompilerParams(
            dimension_semantics=("parallel",)),
        cost_estimate=cost,
    )(ids, tok_table, pos_used, gamma2d, beta2d)
    return out


def reference_forward(x, tok_table, pos_table, gamma, beta):
    """Pure-JAX reference matching the PyTorch forward."""
    B, S = x.shape
    tok = tok_table[x]                       # [B, S, D]
    pos = pos_table[jnp.arange(S)][None]     # [1, S, D]
    emb = tok + pos
    mean = jnp.mean(emb, axis=-1, keepdims=True)
    var = jnp.mean((emb - mean) ** 2, axis=-1, keepdims=True)
    normed = (emb - mean) / jnp.sqrt(var + LN_EPS)
    return normed * gamma + beta


if __name__ == "__main__":
    key = jax.random.PRNGKey(0)
    k_tok, k_pos, k_ids = jax.random.split(key, 3)

    # Deterministic synthetic parameters (nn.Embedding default: N(0, 1);
    # nn.LayerNorm default: gamma=1, beta=0).
    tok_table = jax.random.normal(k_tok, (VOCAB_SIZE, D_MODEL), dtype=jnp.float32)
    pos_table = jax.random.normal(k_pos, (MAX_LEN, D_MODEL), dtype=jnp.float32)
    gamma = jnp.ones((D_MODEL,), dtype=jnp.float32)
    beta = jnp.zeros((D_MODEL,), dtype=jnp.float32)

    # Small example input: batch=2, seq=8 token ids.
    B, S = 2, 8
    x = jax.random.randint(k_ids, (B, S), 0, VOCAB_SIZE, dtype=jnp.int32)

    out = embedding_forward(x, tok_table, pos_table, gamma, beta)
    out = jax.block_until_ready(out)

    ref = reference_forward(x, tok_table, pos_table, gamma, beta)
    assert out.shape == (B, S, D_MODEL)
    assert jnp.allclose(out, ref, atol=1e-4, rtol=1e-4), "mismatch vs reference"

    print("KERNEL_OK")
</pallas_src>

<mosaic_0001>
module attributes {stable_mosaic.version = 11 : i64} {
  func.func @_embedding_kernel(%arg0: i32, %arg1: memref<2x8xi32, #tpu.memory_space<smem>>, %arg2: memref<64x32xf32, #tpu.memory_space<any>>, %arg3: memref<8x32xf32, #tpu.memory_space<vmem>>, %arg4: memref<1x32xf32, #tpu.memory_space<vmem>>, %arg5: memref<1x32xf32, #tpu.memory_space<vmem>>, %arg6: memref<1x8x32xf32, #tpu.memory_space<vmem>>, %arg7: memref<8x32xf32, #tpu.memory_space<vmem>>, %arg8: memref<8x!tpu.dma_semaphore, #tpu.memory_space<semaphore_mem>>) attributes {dimension_semantics = [#tpu.dimension_semantics<parallel>], iteration_bounds = array<i64: 2>, scalar_prefetch = 1 : i64, scratch_operands = 2 : i64, tpu.core_type = #tpu.core_type<tc>, window_params = [{}, {pipeline_mode = #tpu.pipeline_mode<synchronous>, transform_indices = @transform_1, window_bounds = array<i64: 8, 32>}, {pipeline_mode = #tpu.pipeline_mode<synchronous>, transform_indices = @transform_2, window_bounds = array<i64: 1, 32>}, {pipeline_mode = #tpu.pipeline_mode<synchronous>, transform_indices = @transform_3, window_bounds = array<i64: 1, 32>}, {transform_indices = @transform_4, window_bounds = array<i64: 1, 8, 32>}]} {
    %0 = arith.index_cast %arg0 : i32 to index
    %c0 = arith.constant 0 : index
    %1 = memref.load %arg1[%0, %c0] : memref<2x8xi32, #tpu.memory_space<smem>>
    %c0_i32 = arith.constant 0 : i32
    %c0_i32_0 = arith.constant 0 : i32
    %2 = tpu.memref_slice %arg2[%1, %c0_i32_0] : memref<64x32xf32, #tpu.memory_space<any>> -> memref<1x32xf32, #tpu.memory_space<any>>
    %c0_i32_1 = arith.constant 0 : i32
    %c0_i32_2 = arith.constant 0 : i32
    %3 = tpu.memref_slice %arg7[%c0_i32_1, %c0_i32_2] : memref<8x32xf32, #tpu.memory_space<vmem>> -> memref<1x32xf32, #tpu.memory_space<vmem>>
    %4 = tpu.memref_slice %arg8[%c0_i32] : memref<8x!tpu.dma_semaphore, #tpu.memory_space<semaphore_mem>> -> memref<1x!tpu.dma_semaphore, #tpu.memory_space<semaphore_mem>>
    %5 = tpu.memref_squeeze %4 : memref<1x!tpu.dma_semaphore, #tpu.memory_space<semaphore_mem>> -> memref<!tpu.dma_semaphore, #tpu.memory_space<semaphore_mem>>
    tpu.enqueue_dma source(%2 : memref<1x32xf32, #tpu.memory_space<any>>) target(%3 : memref<1x32xf32, #tpu.memory_space<vmem>>) target_semaphore(%5 : memref<!tpu.dma_semaphore, #tpu.memory_space<semaphore_mem>>)
    %6 = arith.index_cast %arg0 : i32 to index
    %c1 = arith.constant 1 : index
    %7 = memref.load %arg1[%6, %c1] : memref<2x8xi32, #tpu.memory_space<smem>>
    %c1_i32 = arith.constant 1 : i32
    %c0_i32_3 = arith.constant 0 : i32
    %8 = tpu.memref_slice %arg2[%7, %c0_i32_3] : memref<64x32xf32, #tpu.memory_space<any>> -> memref<1x32xf32, #tpu.memory_space<any>>
    %c1_i32_4 = arith.constant 1 : i32
    %c0_i32_5 = arith.constant 0 : i32
    %9 = tpu.memref_slice %arg7[%c1_i32_4, %c0_i32_5] : memref<8x32xf32, #tpu.memory_space<vmem>> -> memref<1x32xf32, #tpu.memory_space<vmem>>
    %10 = tpu.memref_slice %arg8[%c1_i32] : memref<8x!tpu.dma_semaphore, #tpu.memory_space<semaphore_mem>> -> memref<1x!tpu.dma_semaphore, #tpu.memory_space<semaphore_mem>>
    %11 = tpu.memref_squeeze %10 : memref<1x!tpu.dma_semaphore, #tpu.memory_space<semaphore_mem>> -> memref<!tpu.dma_semaphore, #tpu.memory_space<semaphore_mem>>
    tpu.enqueue_dma source(%8 : memref<1x32xf32, #tpu.memory_space<any>>) target(%9 : memref<1x32xf32, #tpu.memory_space<vmem>>) target_semaphore(%11 : memref<!tpu.dma_semaphore, #tpu.memory_space<semaphore_mem>>)
    %12 = arith.index_cast %arg0 : i32 to index
    %c2 = arith.constant 2 : index
    %13 = memref.load %arg1[%12, %c2] : memref<2x8xi32, #tpu.memory_space<smem>>
    %c2_i32 = arith.constant 2 : i32
    %c0_i32_6 = arith.constant 0 : i32
    %14 = tpu.memref_slice %arg2[%13, %c0_i32_6] : memref<64x32xf32, #tpu.memory_space<any>> -> memref<1x32xf32, #tpu.memory_space<any>>
    %c2_i32_7 = arith.constant 2 : i32
    %c0_i32_8 = arith.constant 0 : i32
    %15 = tpu.memref_slice %arg7[%c2_i32_7, %c0_i32_8] : memref<8x32xf32, #tpu.memory_space<vmem>> -> memref<1x32xf32, #tpu.memory_space<vmem>>
    %16 = tpu.memref_slice %arg8[%c2_i32] : memref<8x!tpu.dma_semaphore, #tpu.memory_space<semaphore_mem>> -> memref<1x!tpu.dma_semaphore, #tpu.memory_space<semaphore_mem>>
    %17 = tpu.memref_squeeze %16 : memref<1x!tpu.dma_semaphore, #tpu.memory_space<semaphore_mem>> -> memref<!tpu.dma_semaphore, #tpu.memory_space<semaphore_mem>>
    tpu.enqueue_dma source(%14 : memref<1x32xf32, #tpu.memory_space<any>>) target(%15 : memref<1x32xf32, #tpu.memory_space<vmem>>) target_semaphore(%17 : memref<!tpu.dma_semaphore, #tpu.memory_space<semaphore_mem>>)
    %18 = arith.index_cast %arg0 : i32 to index
    %c3 = arith.constant 3 : index
    %19 = memref.load %arg1[%18, %c3] : memref<2x8xi32, #tpu.memory_space<smem>>
    %c3_i32 = arith.constant 3 : i32
    %c0_i32_9 = arith.constant 0 : i32
    %20 = tpu.memref_slice %arg2[%19, %c0_i32_9] : memref<64x32xf32, #tpu.memory_space<any>> -> memref<1x32xf32, #tpu.memory_space<any>>
    %c3_i32_10 = arith.constant 3 : i32
    %c0_i32_11 = arith.constant 0 : i32
    %21 = tpu.memref_slice %arg7[%c3_i32_10, %c0_i32_11] : memref<8x32xf32, #tpu.memory_space<vmem>> -> memref<1x32xf32, #tpu.memory_space<vmem>>
    %22 = tpu.memref_slice %arg8[%c3_i32] : memref<8x!tpu.dma_semaphore, #tpu.memory_space<semaphore_mem>> -> memref<1x!tpu.dma_semaphore, #tpu.memory_space<semaphore_mem>>
    %23 = tpu.memref_squeeze %22 : memref<1x!tpu.dma_semaphore, #tpu.memory_space<semaphore_mem>> -> memref<!tpu.dma_semaphore, #tpu.memory_space<semaphore_mem>>
    tpu.enqueue_dma source(%20 : memref<1x32xf32, #tpu.memory_space<any>>) target(%21 : memref<1x32xf32, #tpu.memory_space<vmem>>) target_semaphore(%23 : memref<!tpu.dma_semaphore, #tpu.memory_space<semaphore_mem>>)
    %24 = arith.index_cast %arg0 : i32 to index
    %c4 = arith.constant 4 : index
    %25 = memref.load %arg1[%24, %c4] : memref<2x8xi32, #tpu.memory_space<smem>>
    %c4_i32 = arith.constant 4 : i32
    %c0_i32_12 = arith.constant 0 : i32
    %26 = tpu.memref_slice %arg2[%25, %c0_i32_12] : memref<64x32xf32, #tpu.memory_space<any>> -> memref<1x32xf32, #tpu.memory_space<any>>
    %c4_i32_13 = arith.constant 4 : i32
    %c0_i32_14 = arith.constant 0 : i32
    %27 = tpu.memref_slice %arg7[%c4_i32_13, %c0_i32_14] : memref<8x32xf32, #tpu.memory_space<vmem>> -> memref<1x32xf32, #tpu.memory_space<vmem>>
    %28 = tpu.memref_slice %arg8[%c4_i32] : memref<8x!tpu.dma_semaphore, #tpu.memory_space<semaphore_mem>> -> memref<1x!tpu.dma_semaphore, #tpu.memory_space<semaphore_mem>>
    %29 = tpu.memref_squeeze %28 : memref<1x!tpu.dma_semaphore, #tpu.memory_space<semaphore_mem>> -> memref<!tpu.dma_semaphore, #tpu.memory_space<semaphore_mem>>
    tpu.enqueue_dma source(%26 : memref<1x32xf32, #tpu.memory_space<any>>) target(%27 : memref<1x32xf32, #tpu.memory_space<vmem>>) target_semaphore(%29 : memref<!tpu.dma_semaphore, #tpu.memory_space<semaphore_mem>>)
    %30 = arith.index_cast %arg0 : i32 to index
    %c5 = arith.constant 5 : index
    %31 = memref.load %arg1[%30, %c5] : memref<2x8xi32, #tpu.memory_space<smem>>
    %c5_i32 = arith.constant 5 : i32
    %c0_i32_15 = arith.constant 0 : i32
    %32 = tpu.memref_slice %arg2[%31, %c0_i32_15] : memref<64x32xf32, #tpu.memory_space<any>> -> memref<1x32xf32, #tpu.memory_space<any>>
    %c5_i32_16 = arith.constant 5 : i32
    %c0_i32_17 = arith.constant 0 : i32
    %33 = tpu.memref_slice %arg7[%c5_i32_16, %c0_i32_17] : memref<8x32xf32, #tpu.memory_space<vmem>> -> memref<1x32xf32, #tpu.memory_space<vmem>>
    %34 = tpu.memref_slice %arg8[%c5_i32] : memref<8x!tpu.dma_semaphore, #tpu.memory_space<semaphore_mem>> -> memref<1x!tpu.dma_semaphore, #tpu.memory_space<semaphore_mem>>
    %35 = tpu.memref_squeeze %34 : memref<1x!tpu.dma_semaphore, #tpu.memory_space<semaphore_mem>> -> memref<!tpu.dma_semaphore, #tpu.memory_space<semaphore_mem>>
    tpu.enqueue_dma source(%32 : memref<1x32xf32, #tpu.memory_space<any>>) target(%33 : memref<1x32xf32, #tpu.memory_space<vmem>>) target_semaphore(%35 : memref<!tpu.dma_semaphore, #tpu.memory_space<semaphore_mem>>)
    %36 = arith.index_cast %arg0 : i32 to index
    %c6 = arith.constant 6 : index
    %37 = memref.load %arg1[%36, %c6] : memref<2x8xi32, #tpu.memory_space<smem>>
    %c6_i32 = arith.constant 6 : i32
    %c0_i32_18 = arith.constant 0 : i32
    %38 = tpu.memref_slice %arg2[%37, %c0_i32_18] : memref<64x32xf32, #tpu.memory_space<any>> -> memref<1x32xf32, #tpu.memory_space<any>>
    %c6_i32_19 = arith.constant 6 : i32
    %c0_i32_20 = arith.constant 0 : i32
    %39 = tpu.memref_slice %arg7[%c6_i32_19, %c0_i32_20] : memref<8x32xf32, #tpu.memory_space<vmem>> -> memref<1x32xf32, #tpu.memory_space<vmem>>
    %40 = tpu.memref_slice %arg8[%c6_i32] : memref<8x!tpu.dma_semaphore, #tpu.memory_space<semaphore_mem>> -> memref<1x!tpu.dma_semaphore, #tpu.memory_space<semaphore_mem>>
    %41 = tpu.memref_squeeze %40 : memref<1x!tpu.dma_semaphore, #tpu.memory_space<semaphore_mem>> -> memref<!tpu.dma_semaphore, #tpu.memory_space<semaphore_mem>>
    tpu.enqueue_dma source(%38 : memref<1x32xf32, #tpu.memory_space<any>>) target(%39 : memref<1x32xf32, #tpu.memory_space<vmem>>) target_semaphore(%41 : memref<!tpu.dma_semaphore, #tpu.memory_space<semaphore_mem>>)
    %42 = arith.index_cast %arg0 : i32 to index
    %c7 = arith.constant 7 : index
    %43 = memref.load %arg1[%42, %c7] : memref<2x8xi32, #tpu.memory_space<smem>>
    %c7_i32 = arith.constant 7 : i32
    %c0_i32_21 = arith.constant 0 : i32
    %44 = tpu.memref_slice %arg2[%43, %c0_i32_21] : memref<64x32xf32, #tpu.memory_space<any>> -> memref<1x32xf32, #tpu.memory_space<any>>
    %c7_i32_22 = arith.constant 7 : i32
    %c0_i32_23 = arith.constant 0 : i32
    %45 = tpu.memref_slice %arg7[%c7_i32_22, %c0_i32_23] : memref<8x32xf32, #tpu.memory_space<vmem>> -> memref<1x32xf32, #tpu.memory_space<vmem>>
    %46 = tpu.memref_slice %arg8[%c7_i32] : memref<8x!tpu.dma_semaphore, #tpu.memory_space<semaphore_mem>> -> memref<1x!tpu.dma_semaphore, #tpu.memory_space<semaphore_mem>>
    %47 = tpu.memref_squeeze %46 : memref<1x!tpu.dma_semaphore, #tpu.memory_space<semaphore_mem>> -> memref<!tpu.dma_semaphore, #tpu.memory_space<semaphore_mem>>
    tpu.enqueue_dma source(%44 : memref<1x32xf32, #tpu.memory_space<any>>) target(%45 : memref<1x32xf32, #tpu.memory_space<vmem>>) target_semaphore(%47 : memref<!tpu.dma_semaphore, #tpu.memory_space<semaphore_mem>>)
    %c0_i32_24 = arith.constant 0 : i32
    %c0_i32_25 = arith.constant 0 : i32
    %48 = tpu.memref_slice %arg2[%1, %c0_i32_25] : memref<64x32xf32, #tpu.memory_space<any>> -> memref<1x32xf32, #tpu.memory_space<any>>
    %c0_i32_26 = arith.constant 0 : i32
    %c0_i32_27 = arith.constant 0 : i32
    %49 = tpu.memref_slice %arg7[%c0_i32_26, %c0_i32_27] : memref<8x32xf32, #tpu.memory_space<vmem>> -> memref<1x32xf32, #tpu.memory_space<vmem>>
    %50 = tpu.memref_slice %arg8[%c0_i32_24] : memref<8x!tpu.dma_semaphore, #tpu.memory_space<semaphore_mem>> -> memref<1x!tpu.dma_semaphore, #tpu.memory_space<semaphore_mem>>
    %51 = tpu.memref_squeeze %50 : memref<1x!tpu.dma_semaphore, #tpu.memory_space<semaphore_mem>> -> memref<!tpu.dma_semaphore, #tpu.memory_space<semaphore_mem>>
    tpu.wait_dma2 semaphore(%51 : memref<!tpu.dma_semaphore, #tpu.memory_space<semaphore_mem>>) src(%48 : memref<1x32xf32, #tpu.memory_space<any>>) dst(%49 : memref<1x32xf32, #tpu.memory_space<vmem>>)
    %c1_i32_28 = arith.constant 1 : i32
    %c0_i32_29 = arith.constant 0 : i32
    %52 = tpu.memref_slice %arg2[%7, %c0_i32_29] : memref<64x32xf32, #tpu.memory_space<any>> -> memref<1x32xf32, #tpu.memory_space<any>>
    %c1_i32_30 = arith.constant 1 : i32
    %c0_i32_31 = arith.constant 0 : i32
    %53 = tpu.memref_slice %arg7[%c1_i32_30, %c0_i32_31] : memref<8x32xf32, #tpu.memory_space<vmem>> -> memref<1x32xf32, #tpu.memory_space<vmem>>
    %54 = tpu.memref_slice %arg8[%c1_i32_28] : memref<8x!tpu.dma_semaphore, #tpu.memory_space<semaphore_mem>> -> memref<1x!tpu.dma_semaphore, #tpu.memory_space<semaphore_mem>>
    %55 = tpu.memref_squeeze %54 : memref<1x!tpu.dma_semaphore, #tpu.memory_space<semaphore_mem>> -> memref<!tpu.dma_semaphore, #tpu.memory_space<semaphore_mem>>
    tpu.wait_dma2 semaphore(%55 : memref<!tpu.dma_semaphore, #tpu.memory_space<semaphore_mem>>) src(%52 : memref<1x32xf32, #tpu.memory_space<any>>) dst(%53 : memref<1x32xf32, #tpu.memory_space<vmem>>)
    %c2_i32_32 = arith.constant 2 : i32
    %c0_i32_33 = arith.constant 0 : i32
    %56 = tpu.memref_slice %arg2[%13, %c0_i32_33] : memref<64x32xf32, #tpu.memory_space<any>> -> memref<1x32xf32, #tpu.memory_space<any>>
    %c2_i32_34 = arith.constant 2 : i32
    %c0_i32_35 = arith.constant 0 : i32
    %57 = tpu.memref_slice %arg7[%c2_i32_34, %c0_i32_35] : memref<8x32xf32, #tpu.memory_space<vmem>> -> memref<1x32xf32, #tpu.memory_space<vmem>>
    %58 = tpu.memref_slice %arg8[%c2_i32_32] : memref<8x!tpu.dma_semaphore, #tpu.memory_space<semaphore_mem>> -> memref<1x!tpu.dma_semaphore, #tpu.memory_space<semaphore_mem>>
    %59 = tpu.memref_squeeze %58 : memref<1x!tpu.dma_semaphore, #tpu.memory_space<semaphore_mem>> -> memref<!tpu.dma_semaphore, #tpu.memory_space<semaphore_mem>>
    tpu.wait_dma2 semaphore(%59 : memref<!tpu.dma_semaphore, #tpu.memory_space<semaphore_mem>>) src(%56 : memref<1x32xf32, #tpu.memory_space<any>>) dst(%57 : memref<1x32xf32, #tpu.memory_space<vmem>>)
    %c3_i32_36 = arith.constant 3 : i32
    %c0_i32_37 = arith.constant 0 : i32
    %60 = tpu.memref_slice %arg2[%19, %c0_i32_37] : memref<64x32xf32, #tpu.memory_space<any>> -> memref<1x32xf32, #tpu.memory_space<any>>
    %c3_i32_38 = arith.constant 3 : i32
    %c0_i32_39 = arith.constant 0 : i32
    %61 = tpu.memref_slice %arg7[%c3_i32_38, %c0_i32_39] : memref<8x32xf32, #tpu.memory_space<vmem>> -> memref<1x32xf32, #tpu.memory_space<vmem>>
    %62 = tpu.memref_slice %arg8[%c3_i32_36] : memref<8x!tpu.dma_semaphore, #tpu.memory_space<semaphore_mem>> -> memref<1x!tpu.dma_semaphore, #tpu.memory_space<semaphore_mem>>
    %63 = tpu.memref_squeeze %62 : memref<1x!tpu.dma_semaphore, #tpu.memory_space<semaphore_mem>> -> memref<!tpu.dma_semaphore, #tpu.memory_space<semaphore_mem>>
    tpu.wait_dma2 semaphore(%63 : memref<!tpu.dma_semaphore, #tpu.memory_space<semaphore_mem>>) src(%60 : memref<1x32xf32, #tpu.memory_space<any>>) dst(%61 : memref<1x32xf32, #tpu.memory_space<vmem>>)
    %c4_i32_40 = arith.constant 4 : i32
    %c0_i32_41 = arith.constant 0 : i32
    %64 = tpu.memref_slice %arg2[%25, %c0_i32_41] : memref<64x32xf32, #tpu.memory_space<any>> -> memref<1x32xf32, #tpu.memory_space<any>>
    %c4_i32_42 = arith.constant 4 : i32
    %c0_i32_43 = arith.constant 0 : i32
    %65 = tpu.memref_slice %arg7[%c4_i32_42, %c0_i32_43] : memref<8x32xf32, #tpu.memory_space<vmem>> -> memref<1x32xf32, #tpu.memory_space<vmem>>
    %66 = tpu.memref_slice %arg8[%c4_i32_40] : memref<8x!tpu.dma_semaphore, #tpu.memory_space<semaphore_mem>> -> memref<1x!tpu.dma_semaphore, #tpu.memory_space<semaphore_mem>>
    %67 = tpu.memref_squeeze %66 : memref<1x!tpu.dma_semaphore, #tpu.memory_space<semaphore_mem>> -> memref<!tpu.dma_semaphore, #tpu.memory_space<semaphore_mem>>
    tpu.wait_dma2 semaphore(%67 : memref<!tpu.dma_semaphore, #tpu.memory_space<semaphore_mem>>) src(%64 : memref<1x32xf32, #tpu.memory_space<any>>) dst(%65 : memref<1x32xf32, #tpu.memory_space<vmem>>)
    %c5_i32_44 = arith.constant 5 : i32
    %c0_i32_45 = arith.constant 0 : i32
    %68 = tpu.memref_slice %arg2[%31, %c0_i32_45] : memref<64x32xf32, #tpu.memory_space<any>> -> memref<1x32xf32, #tpu.memory_space<any>>
    %c5_i32_46 = arith.constant 5 : i32
    %c0_i32_47 = arith.constant 0 : i32
    %69 = tpu.memref_slice %arg7[%c5_i32_46, %c0_i32_47] : memref<8x32xf32, #tpu.memory_space<vmem>> -> memref<1x32xf32, #tpu.memory_space<vmem>>
    %70 = tpu.memref_slice %arg8[%c5_i32_44] : memref<8x!tpu.dma_semaphore, #tpu.memory_space<semaphore_mem>> -> memref<1x!tpu.dma_semaphore, #tpu.memory_space<semaphore_mem>>
    %71 = tpu.memref_squeeze %70 : memref<1x!tpu.dma_semaphore, #tpu.memory_space<semaphore_mem>> -> memref<!tpu.dma_semaphore, #tpu.memory_space<semaphore_mem>>
    tpu.wait_dma2 semaphore(%71 : memref<!tpu.dma_semaphore, #tpu.memory_space<semaphore_mem>>) src(%68 : memref<1x32xf32, #tpu.memory_space<any>>) dst(%69 : memref<1x32xf32, #tpu.memory_space<vmem>>)
    %c6_i32_48 = arith.constant 6 : i32
    %c0_i32_49 = arith.constant 0 : i32
    %72 = tpu.memref_slice %arg2[%37, %c0_i32_49] : memref<64x32xf32, #tpu.memory_space<any>> -> memref<1x32xf32, #tpu.memory_space<any>>
    %c6_i32_50 = arith.constant 6 : i32
    %c0_i32_51 = arith.constant 0 : i32
    %73 = tpu.memref_slice %arg7[%c6_i32_50, %c0_i32_51] : memref<8x32xf32, #tpu.memory_space<vmem>> -> memref<1x32xf32, #tpu.memory_space<vmem>>
    %74 = tpu.memref_slice %arg8[%c6_i32_48] : memref<8x!tpu.dma_semaphore, #tpu.memory_space<semaphore_mem>> -> memref<1x!tpu.dma_semaphore, #tpu.memory_space<semaphore_mem>>
    %75 = tpu.memref_squeeze %74 : memref<1x!tpu.dma_semaphore, #tpu.memory_space<semaphore_mem>> -> memref<!tpu.dma_semaphore, #tpu.memory_space<semaphore_mem>>
    tpu.wait_dma2 semaphore(%75 : memref<!tpu.dma_semaphore, #tpu.memory_space<semaphore_mem>>) src(%72 : memref<1x32xf32, #tpu.memory_space<any>>) dst(%73 : memref<1x32xf32, #tpu.memory_space<vmem>>)
    %c7_i32_52 = arith.constant 7 : i32
    %c0_i32_53 = arith.constant 0 : i32
    %76 = tpu.memref_slice %arg2[%43, %c0_i32_53] : memref<64x32xf32, #tpu.memory_space<any>> -> memref<1x32xf32, #tpu.memory_space<any>>
    %c7_i32_54 = arith.constant 7 : i32
    %c0_i32_55 = arith.constant 0 : i32
    %77 = tpu.memref_slice %arg7[%c7_i32_54, %c0_i32_55] : memref<8x32xf32, #tpu.memory_space<vmem>> -> memref<1x32xf32, #tpu.memory_space<vmem>>
    %78 = tpu.memref_slice %arg8[%c7_i32_52] : memref<8x!tpu.dma_semaphore, #tpu.memory_space<semaphore_mem>> -> memref<1x!tpu.dma_semaphore, #tpu.memory_space<semaphore_mem>>
    %79 = tpu.memref_squeeze %78 : memref<1x!tpu.dma_semaphore, #tpu.memory_space<semaphore_mem>> -> memref<!tpu.dma_semaphore, #tpu.memory_space<semaphore_mem>>
    tpu.wait_dma2 semaphore(%79 : memref<!tpu.dma_semaphore, #tpu.memory_space<semaphore_mem>>) src(%76 : memref<1x32xf32, #tpu.memory_space<any>>) dst(%77 : memref<1x32xf32, #tpu.memory_space<vmem>>)
    %c0_56 = arith.constant 0 : index
    %c0_57 = arith.constant 0 : index
    %80 = vector.load %arg7[%c0_56, %c0_57] : memref<8x32xf32, #tpu.memory_space<vmem>>, vector<8x32xf32>
    %c0_58 = arith.constant 0 : index
    %c0_59 = arith.constant 0 : index
    %81 = vector.load %arg3[%c0_58, %c0_59] : memref<8x32xf32, #tpu.memory_space<vmem>>, vector<8x32xf32>
    %82 = arith.addf %80, %81 : vector<8x32xf32>
    %cst = arith.constant dense<0.000000e+00> : vector<8xf32>
    %83 = vector.multi_reduction <add>, %82, %cst [1] : vector<8x32xf32> to vector<8xf32>
    %84 = vector.shape_cast %83 : vector<8xf32> to vector<8x1xf32>
    %cst_60 = arith.constant 3.200000e+01 : f32
    %85 = vector.broadcast %cst_60 : f32 to vector<8x1xf32>
    %86 = arith.divf %84, %85 : vector<8x1xf32>
    %87 = vector.broadcast %86 : vector<8x1xf32> to vector<8x32xf32>
    %88 = arith.subf %82, %87 : vector<8x32xf32>
    %89 = arith.mulf %88, %88 : vector<8x32xf32>
    %cst_61 = arith.constant dense<0.000000e+00> : vector<8xf32>
    %90 = vector.multi_reduction <add>, %89, %cst_61 [1] : vector<8x32xf32> to vector<8xf32>
    %91 = vector.shape_cast %90 : vector<8xf32> to vector<8x1xf32>
    %cst_62 = arith.constant 3.200000e+01 : f32
    %92 = vector.broadcast %cst_62 : f32 to vector<8x1xf32>
    %93 = arith.divf %91, %92 : vector<8x1xf32>
    %cst_63 = arith.constant 9.99999974E-6 : f32
    %94 = vector.broadcast %cst_63 : f32 to vector<8x1xf32>
    %95 = arith.addf %93, %94 : vector<8x1xf32>
    %96 = math.rsqrt %95 : vector<8x1xf32>
    %97 = vector.broadcast %96 : vector<8x1xf32> to vector<8x32xf32>
    %98 = arith.mulf %88, %97 : vector<8x32xf32>
    %c0_64 = arith.constant 0 : index
    %c0_65 = arith.constant 0 : index
    %99 = vector.load %arg4[%c0_64, %c0_65] : memref<1x32xf32, #tpu.memory_space<vmem>>, vector<1x32xf32>
    %100 = vector.broadcast %99 : vector<1x32xf32> to vector<8x32xf32>
    %101 = arith.mulf %98, %100 : vector<8x32xf32>
    %c0_66 = arith.constant 0 : index
    %c0_67 = arith.constant 0 : index
    %102 = vector.load %arg5[%c0_66, %c0_67] : memref<1x32xf32, #tpu.memory_space<vmem>>, vector<1x32xf32>
    %103 = vector.broadcast %102 : vector<1x32xf32> to vector<8x32xf32>
    %104 = arith.addf %101, %103 : vector<8x32xf32>
    %105 = vector.shape_cast %104 : vector<8x32xf32> to vector<1x8x32xf32>
    %c0_68 = arith.constant 0 : index
    %c0_69 = arith.constant 0 : index
    %c0_70 = arith.constant 0 : index
    %106 = vector.load %arg6[%c0_68, %c0_69, %c0_70] : memref<1x8x32xf32, #tpu.memory_space<vmem>>, vector<1x8x32xf32>
    tpu.vector_store %arg6[%c0_68, %c0_69, %c0_70], %105 {strides = array<i32>} : memref<1x8x32xf32, #tpu.memory_space<vmem>>, vector<1x8x32xf32>,
    return
  }
  func.func @transform_1(%arg0: i32, %arg1: memref<2x8xi32, #tpu.memory_space<smem>>) -> (i32, i32) {
    %c0_i32 = arith.constant 0 : i32
    %c0_i32_0 = arith.constant 0 : i32
    %c0_i32_1 = arith.constant 0 : i32
    return %c0_i32, %c0_i32_0 : i32, i32
  }
  func.func @transform_2(%arg0: i32, %arg1: memref<2x8xi32, #tpu.memory_space<smem>>) -> (i32, i32) {
    %c0_i32 = arith.constant 0 : i32
    %c0_i32_0 = arith.constant 0 : i32
    %c0_i32_1 = arith.constant 0 : i32
    return %c0_i32, %c0_i32_0 : i32, i32
  }
  func.func @transform_3(%arg0: i32, %arg1: memref<2x8xi32, #tpu.memory_space<smem>>) -> (i32, i32) {
    %c0_i32 = arith.constant 0 : i32
    %c0_i32_0 = arith.constant 0 : i32
    %c0_i32_1 = arith.constant 0 : i32
    return %c0_i32, %c0_i32_0 : i32, i32
  }
  func.func @transform_4(%arg0: i32, %arg1: memref<2x8xi32, #tpu.memory_space<smem>>) -> (i32, i32, i32) {
    %c0_i32 = arith.constant 0 : i32
    %c0_i32_0 = arith.constant 0 : i32
    %c0_i32_1 = arith.constant 0 : i32
    return %arg0, %c0_i32, %c0_i32_0 : i32, i32, i32
  }
}

</mosaic_0001>

<bundles_post_ra>
// kernel: tpu_custom_call.1
= control target key start
LH: loop header
LB: loop body
LE: loop exit
PB: predicated region body
PF: predicated region fallthrough
CT: control target
= control target key end

     0   :  { %s1149_s0 = inlined_call_operand.vmem [shape: s32[2,8], index: 0, kind: input, shape index: {}]   ;;  %s1150_s1 = inlined_call_operand.vmem [shape: f32[64,32], index: 1, kind: input, shape index: {}]   ;;  %s1151_s2 = inlined_call_operand.vmem [shape: f32[8,32], index: 2, kind: input, shape index: {}]   ;;  %s1152_s3 = inlined_call_operand.vmem [shape: f32[1,32], index: 3, kind: input, shape index: {}]   ;;  %s1153_s4 = inlined_call_operand.vmem [shape: f32[1,32], index: 4, kind: input, shape index: {}]   ;;  %s1154_s5 = inlined_call_operand.hbm [shape: f32[2,8,32], index: 5, kind: output, shape index: {}]  }
   0x1   :  { %s10_s20 = sshll.u32 %s1149_s0, 4  ;;  %s11_s20 = int_to_ptr.vmem [resolvable:$true] %s10_s20 }
   0x2   :  { %s871_s21 = scalar_lea.vmem %s11_s20, 32  ;;  %p876_p1 = scmp.lt.s32.totalorder %s11_s20, %s11_s20 }
   0x3   :  { %p872_p0 = scmp.ne.s32.totalorder %s11_s20, %s871_s21  ;;  %p877_p2 = scmp.lt.s32.totalorder %s871_s21, %s871_s21 }
   0x5   :  { %p878_p3 = por %p877_p2, %p876_p1 }
   0x7   :  { %p879_p4 = pnand %p878_p3, %p872_p0 }
   0x9   :  { %882 = shalt.err (!%p879_p4)  }
   0xa   :  { %s965_s22 = smov [#allocation5]  }
   0xb   :  { %13 = dma.vmem_to_smem %s11_s20, 32, %s965_s22, [#allocation4] }
   0xc   :  { %927 = dma.done.wait [#allocation4], 32 }
   0xd   :  { %928 = vsyncadd [#allocation4], 4294967264 }
   0xe   :  { %15 = sfence }
   0xf   :  { %16 = vsyncpa [#allocation7], 0 }
  0x10   :  { %18 = vsyncpa [#allocation7 + $0x1], 0  ;;  %s1000_s23 = smov 0   ;;  %s1002_s24 = smov 0  }
  0x11   :  { %s1004_s0 = smov 0   ;;  %s1006_s25 = smov 0  }
  0x12 LB: > { %s809_s26 = sadd.s32 4294967295, %s963_s25   ;;  %s810_s27 = sadd.s32 4294967294, %s963_s25   ;;  %s963_s25 = sphi %s1006_s25, %s1160_s25   ;;  %s959_s0 = sphi %s1004_s0, %s1159_s0   ;;  %s955_s24 = sphi %s1002_s24, %s1158_s24   ;;  %s951_s23 = sphi %s1000_s23, %s1157_s23  }
  0x13   : > { %s1023_s28 = sadd.s32 1, %s963_s25   ;;  %s94_s29 = sadd.s32 1, %s959_s0 }
  0x14   : > { %s91_s30 = ssub.s32 %s963_s25, %s1023_s28  ;;  %p104_p5 = scmp.ne.s32.totalorder %s959_s0, %s955_s24 }
  0x15   : > { %p92_p6 = scmp.eq.s32.totalorder %s91_s30, 0  ;;  %p105_p7 = scmp.eq.s32.totalorder %s809_s26, 1 }
  0x16   : > { %p110_p8 = scmp.ne.s32.totalorder %s955_s24, %s951_s23  ;;  %p111_p9 = scmp.eq.s32.totalorder %s810_s27, 1 }
  0x17   : > { %s1033_s6 = scalar_select %p92_p6, %s959_s0, %s94_s29  }
  0x18   : > { %p1035_p10 = por %p105_p7, %p104_p5  ;;  %p1039_p11 = por %p111_p9, %p110_p8 }
  0x19   : > { %p812_p12 = scmp.ge.s32.totalorder %s963_s25, 1  ;;  %p138_p13 = scmp.lt.s32.totalorder %s963_s25, 3 }
  0x1b   : > { %p139_p0 = pnand %p812_p12, %p138_p13 }
  0x1c   : > { %s154_s9 = sand.u32 (!%p139_p0), 1, %s955_s24   ;;  %s1046_s10 = sshll.u32 (!%p139_p0), %s809_s26, 7 }
  0x1d   : > { %142 = sbr.rel (%p139_p0) target bundleno = 456 (0x1c8), region = 32  ;;  %s1050_s11 = sshll.u32 (!%p139_p0), %s154_s9, 3 }
  0x1e   : > { %s158_s12 = sld [smem:[#allocation5 + %s1046_s10]] (!%p139_p0)  ;;  %s156_s16 = scalar_lea.vmem (!%p139_p0), [#allocation6], %s1050_s11 }
  0x24   : > { %s159_s15 = scalar_lea.vmem %s1150_s1, %s158_s12 }
  0x25   : > { %v177_v0 = vld [vmem:[%s159_s15] sm:$0x1] }
  0x26   : > { %178 = vst [vmem:[#allocation2] sm:$0x1] %v177_v0 }
  0x27   : > { %203 = vsyncadd [#allocation3], 16  ;;  %s204_s17 = sadd.s32 1, %s1046_s10 }
  0x28   : > { %s205_s18 = sld [smem:[#allocation5 + %s204_s17]] }
  0x2e   : > { %s206_s21 = scalar_lea.vmem %s1150_s1, %s205_s18 }
  0x2f   : > { %v226_v1 = vld [vmem:[%s206_s21] sm:$0x1] }
  0x30   : > { %227 = vst [vmem:[#allocation2 + $0x1] sm:$0x1] %v226_v1 }
  0x31   : > { %252 = vsyncadd [#allocation3 + $0x1], 16  ;;  %s253_s22 = sadd.s32 2, %s1046_s10 }
  0x32   : > { %s254_s26 = sld [smem:[#allocation5 + %s253_s22]] }
  0x38   : > { %s255_s30 = scalar_lea.vmem %s1150_s1, %s254_s26 }
  0x39   : > { %v275_v2 = vld [vmem:[%s255_s30] sm:$0x1] }
  0x3a   : > { %276 = vst [vmem:[#allocation2 + $0x2] sm:$0x1] %v275_v2 }
  0x3b   : > { %301 = vsyncadd [#allocation3 + $0x2], 16  ;;  %s302_s12 = sadd.s32 3, %s1046_s10 }
  0x3c   : > { %s303_s13 = sld [smem:[#allocation5 + %s302_s12]] }
  0x42   : > { %s304_s17 = scalar_lea.vmem %s1150_s1, %s303_s13 }
  0x43   : > { %v324_v3 = vld [vmem:[%s304_s17] sm:$0x1] }
  0x44   : > { %325 = vst [vmem:[#allocation2 + $0x3] sm:$0x1] %v324_v3 }
  0x45   : > { %350 = vsyncadd [#allocation3 + $0x3], 16  ;;  %s351_s18 = sadd.s32 4, %s1046_s10 }
  0x46   : > { %s352_s19 = sld [smem:[#allocation5 + %s351_s18]] }
  0x4c   : > { %s353_s22 = scalar_lea.vmem %s1150_s1, %s352_s19 }
  0x4d   : > { %v373_v4 = vld [vmem:[%s353_s22] sm:$0x1] }
  0x4e   : > { %374 = vst [vmem:[#allocation2 + $0x4] sm:$0x1] %v373_v4 }
  0x4f   : > { %399 = vsyncadd [#allocation3 + $0x4], 16  ;;  %s400_s26 = sadd.s32 5, %s1046_s10 }
  0x50   : > { %s401_s27 = sld [smem:[#allocation5 + %s400_s26]] }
  0x56   : > { %s402_s12 = scalar_lea.vmem %s1150_s1, %s401_s27 }
  0x57   : > { %v422_v5 = vld [vmem:[%s402_s12] sm:$0x1] }
  0x58   : > { %423 = vst [vmem:[#allocation2 + $0x5] sm:$0x1] %v422_v5 }
  0x59   : > { %448 = vsyncadd [#allocation3 + $0x5], 16  ;;  %s449_s13 = sadd.s32 6, %s1046_s10 }
  0x5a   : > { %s450_s14 = sld [smem:[#allocation5 + %s449_s13]] }
  0x60   : > { %s451_s18 = scalar_lea.vmem %s1150_s1, %s450_s14 }
  0x61   : > { %v471_v6 = vld [vmem:[%s451_s18] sm:$0x1] }
  0x62   : > { %472 = vst [vmem:[#allocation2 + $0x6] sm:$0x1] %v471_v6 }
  0x63   : > { %497 = vsyncadd [#allocation3 + $0x6], 16  ;;  %s498_s19 = sadd.s32 7, %s1046_s10 }
  0x64   : > { %s499_s20 = sld [smem:[#allocation5 + %s498_s19]] }
  0x6a   : > { %s500_s26 = scalar_lea.vmem %s1150_s1, %s499_s20 }
  0x6b   : > { %v520_v7 = vld [vmem:[%s500_s26] sm:$0x1] }
  0x6c   : > { %521 = vst [vmem:[#allocation2 + $0x7] sm:$0x1] %v520_v7 }
  0x6d   : > { %546 = vsyncadd [#allocation3 + $0x7], 16 }
  0x6e   : > { %929 = dma.done.wait [#allocation3], 16 }
  0x6f   : > { %930 = vsyncadd [#allocation3], 4294967280 }
  0x70   : > { %931 = dma.done.wait [#allocation3 + $0x1], 16 }
  0x71   : > { %932 = vsyncadd [#allocation3 + $0x1], 4294967280 }
  0x72   : > { %933 = dma.done.wait [#allocation3 + $0x2], 16 }
  0x73   : > { %934 = vsyncadd [#allocation3 + $0x2], 4294967280 }
  0x74   : > { %935 = dma.done.wait [#allocation3 + $0x3], 16 }
  0x75   : > { %936 = vsyncadd [#allocation3 + $0x3], 4294967280 }
  0x76   : > { %937 = dma.done.wait [#allocation3 + $0x4], 16 }
  0x77   : > { %938 = vsyncadd [#allocation3 + $0x4], 4294967280 }
  0x78   : > { %939 = dma.done.wait [#allocation3 + $0x5], 16 }
  0x79   : > { %940 = vsyncadd [#allocation3 + $0x5], 4294967280 }
  0x7a   : > { %941 = dma.done.wait [#allocation3 + $0x6], 16 }
  0x7b   : > { %942 = vsyncadd [#allocation3 + $0x6], 4294967280 }
  0x7c   : > { %943 = dma.done.wait [#allocation3 + $0x7], 16 }
  0x7d   : > { %944 = vsyncadd [#allocation3 + $0x7], 4294967280  ;;  %v564_v8 = vld [vmem:[#allocation2] sm:$0xff]  ;;  %vm567_vm0 = vcmask 261120   ;;  %s613_s15 = sshll.u32 %s156_s16, 4  ;;  %s1102_s19 = scalar_lea.hbm %s1154_s5, %s1046_s10  ;;  %s1104_s15 = int_to_ptr.vmem [resolvable:$true] %s613_s15 }
  0x7e   : > { %v565_v9 = vld [vmem:[%s1151_s2] sm:$0xff]  ;;  %s600_s20 = scalar_lea.sflag [#allocation7], %s154_s9  ;;  %s883_s21 = scalar_lea.vmem %s1104_s15, 128 }
  0x7f   : > { %v566_v10 = vadd.f32 %v565_v9, %v564_v8  ;;  %v815_v21 = vld [vmem:[%s1152_s3] ss:$0 sm:$0xff]  ;;  %p884_p1 = scmp.ne.s32.totalorder %s1104_s15, %s883_s21  ;;  %s966_s22 = smov [#allocation6]  }
  0x80   : > { %v816_v23 = vld [vmem:[%s1153_s4] ss:$0 sm:$0xff]  ;;  %s887_s26 = sshll.u32 %s966_s22, 4  ;;  %s888_s26 = int_to_ptr.vmem [resolvable:$false] %s887_s26 }
  0x81   : > { %v568_v11 = vsel %vm567_vm0, %v566_v10, 0.0  ;;  %p885_p2 = pnand %p884_p1, %p1035_p10  ;;  %s889_s10 = scalar_lea.vmem %s888_s26, 256 }
  0x82   : > { %569 = vadd.xlane.f32.xlu0 %v568_v11  ;;  %p890_p4 = scmp.lt.s32.totalorder %s1104_s15, %s888_s26  ;;  %p891_p5 = scmp.lt.s32.totalorder %s889_s10, %s883_s21 }
  0x83   : > { %p886_p3 = pneg %p885_p2 }
  0x84   : > { %p892_p6 = por %p891_p5, %p890_p4 }
  0x86   : > { %p893_p7 = pnand %p892_p6, %p886_p3 }
 0x10f   : > { %v570_v12 = vpop.xlane.xlu0 %569 }
 0x110   : > { %v572_v13 = vmul.f32 0.03125, %v570_v12 }
 0x112   : > { %v573_v14 = vsub.f32 %v566_v10, %v572_v13 }
 0x114   : > { %v574_v15 = vmul.f32 %v573_v14, %v573_v14 }
 0x116   : > { %v575_v16 = vsel %vm567_vm0, %v574_v15, 0.0 }
 0x117   : > { %576 = vadd.xlane.f32.xlu0 %v575_v16 }
 0x1a4   : > { %v577_v17 = vpop.xlane.xlu0 %576 }
 0x1a5   : > { %v578_v18 = vmul.f32 0.03125, %v577_v17 }
 0x1a7   : > { %v579_v19 = vadd.f32 1e-05, %v578_v18 }
 0x1a9   : > { %869 = vrsqrt.f32 %v579_v19 }
 0x1b3   : > { %v870_v20 = vpop.eup %869 }
 0x1b4   : > { %v581_v22 = vmul.f32 %v870_v20, %v573_v14 }
 0x1b6   : > { %v589_v24 = vmul.f32 %v815_v21, %v581_v22 }
 0x1b8   : > { %v597_v25 = vadd.f32 %v816_v23, %v589_v24 }
 0x1ba   : > { %598 = vst.msk [vmem:[%s156_s16] sm:$0xff] %vm567_vm0, %v597_v25 }
 0x1bb   : > { %896 = shalt.err (!%p893_p7)
}
 0x1bc   : > { %s897_s9 = scalar_lea.hbm %s1102_s19, 128  ;;  %s901_s27 = scalar_lea.hbm %s1154_s5, 256 }
 0x1bd   : > { %p898_p8 = scmp.ne.s32.totalorder %s1102_s19, %s897_s9  ;;  %p902_p13 = scmp.lt.u32.totalorder %s1102_s19, %s1154_s5 }
 0x1be   : > { %p903_p0 = scmp.lt.u32.totalorder %s901_s27, %s897_s9  ;;  %p905_p2 = scmp.lt.u32.totalorder %s897_s9, %s1102_s19 }
 0x1bf   : > { %p899_p9 = pnand %p898_p8, %p1035_p10 }
 0x1c0   : > { %p904_p1 = por %p903_p0, %p902_p13 }
 0x1c1   : > { %p900_p12 = pneg %p899_p9 }
 0x1c2   : > { %p906_p3 = por %p905_p2, %p904_p1 }
 0x1c4   : > { %p907_p4 = pnand %p906_p3, %p900_p12 }
 0x1c6   : > { %910 = shalt.err (!%p907_p4)
}
 0x1c7   : > { %829 = dma.vmem_to_hbm [thread:$0]  (%p1035_p10), %s1104_s15, 128, %s1102_s19, %s600_s20  }
 0x1c8 PF: > { %p835_p5 = scmp.ge.s32.totalorder %s963_s25, 2  ;;  %s625_s12 = sand.u32 1, %s951_s23  }
 0x1c9   : > { %s626_s13 = scalar_lea.sflag [#allocation7], %s625_s12 }
 0x1ca   : > { %p832_p6 = pnand %p835_p5, %p1039_p11 }
 0x1cc   : > { %946 = dma.done.wait (!%p832_p6), %s626_s13, 128  }
 0x1cd   : > { %948 = vsyncadd (!%p832_p6), %s626_s13, 4294967168  ;;  %p21_p7 = scmp.ge.s32.totalorder %s1023_s28, 4   ;;  %s1157_s23 = smov %s955_s24 }
 0x1ce   : > { %s1158_s24 = smov %s959_s0  ;;  %s1159_s0 = smov %s1033_s6 }
 0x1cf   : > { %s1160_s25 = smov %s1023_s28  ;;  %23 = sbr.rel (!%p21_p7) target bundleno = 18 (0x12), region = 413 }
 0x1d6   :  { %631 = vsyncpa [#allocation7], 1 }
 0x1d7   :  { %633 = vsyncpa [#allocation7 + $0x1], 1 }
 0x1d8   :  { %634 = vsyncmov [#allocation3] }
 0x1db   :  { %s635_s25 = vpop.sfrf %634 }
 0x1dc   :  { %p821_p10 = scmp.ne.s32.totalorder %s635_s25, 0 }
 0x1de   :  { %639 = shalt.err (%p821_p10)  }
 0x1df   :  { %641 = vsyncmov [#allocation3 + $0x1] }
 0x1e2   :  { %s642_s7 = vpop.sfrf %641 }
 0x1e3   :  { %p822_p11 = scmp.ne.s32.totalorder %s642_s7, 0 }
 0x1e5   :  { %646 = shalt.err (%p822_p11)  }
 0x1e6   :  { %648 = vsyncmov [#allocation3 + $0x2] }
 0x1e9   :  { %s649_s8 = vpop.sfrf %648 }
 0x1ea   :  { %p823_p8 = scmp.ne.s32.totalorder %s649_s8, 0 }
 0x1ec   :  { %653 = shalt.err (%p823_p8)  }
 0x1ed   :  { %655 = vsyncmov [#allocation3 + $0x3] }
 0x1f0   :  { %s656_s14 = vpop.sfrf %655 }
 0x1f1   :  { %p824_p9 = scmp.ne.s32.totalorder %s656_s14, 0 }
 0x1f3   :  { %660 = shalt.err (%p824_p9)  }
 0x1f4   :  { %662 = vsyncmov [#allocation3 + $0x4] }
 0x1f7   :  { %s663_s28 = vpop.sfrf %662 }
 0x1f8   :  { %p825_p12 = scmp.ne.s32.totalorder %s663_s28, 0 }
 0x1fa   :  { %667 = shalt.err (%p825_p12)  }
 0x1fb   :  { %669 = vsyncmov [#allocation3 + $0x5] }
 0x1fe   :  { %s670_s1 = vpop.sfrf %669 }
 0x1ff   :  { %p826_p13 = scmp.ne.s32.totalorder %s670_s1, 0 }
 0x201   :  { %674 = shalt.err (%p826_p13)  }
 0x202   :  { %676 = vsyncmov [#allocation3 + $0x6] }
 0x205   :  { %s677_s2 = vpop.sfrf %676 }
 0x206   :  { %p827_p0 = scmp.ne.s32.totalorder %s677_s2, 0 }
 0x208   :  { %681 = shalt.err (%p827_p0)  }
 0x209   :  { %683 = vsyncmov [#allocation3 + $0x7] }
 0x20c   :  { %s684_s3 = vpop.sfrf %683 }
 0x20d   :  { %p828_p1 = scmp.ne.s32.totalorder %s684_s3, 0 }
 0x20f   :  { %688 = shalt.err (%p828_p1)  }

</bundles_post_ra>
